<compile_context>
chip_gen: v7x
topology: tpu7x:2x2x1
jax: 0.10.0
libtpu: 0.0.40
codegen_flags: <defaults>
</compile_context>

<pallas_src>
import math

import jax
import jax.numpy as jnp
from jax import lax
from jax.experimental import pallas as pl
from jax.experimental.pallas import tpu as pltpu

# ---------------- config (small, consistent with the module) ----------------
BATCH = 2
SEQ = 8          # T (== block_size for the causal mask)
N_EMBD = 32      # C
N_HEAD = 4
HEAD_DIM = N_EMBD // N_HEAD
LN_EPS = 1e-5
NEG_INF = -1e30


# ---------------------------- in-kernel helpers ------------------------------
def _layernorm(x, w, b):
    mu = jnp.mean(x, axis=-1, keepdims=True)
    var = jnp.mean((x - mu) ** 2, axis=-1, keepdims=True)
    return (x - mu) * lax.rsqrt(var + LN_EPS) * w + b


def _gelu_tanh(x):
    c = math.sqrt(2.0 / math.pi)
    return 0.5 * x * (1.0 + jnp.tanh(c * (x + 0.044715 * x * x * x)))


# --------------------------------- kernel ------------------------------------
def block_kernel(x_ref,
                 ln1_w_ref, ln1_b_ref,
                 wqkv_ref, bqkv_ref,
                 wproj_ref, bproj_ref,
                 ln2_w_ref, ln2_b_ref,
                 wfc_ref, bfc_ref, wfcp_ref, bfcp_ref,
                 o_ref):
    T, C = x_ref.shape                       # batch dim squeezed by BlockSpec
    H, HD = N_HEAD, HEAD_DIM

    x = x_ref[...]                           # (T, C)

    # ---- attention branch: ln_1 -> fused (RoPE-folded) QKV -> SDPA -> c_proj
    h = _layernorm(x, ln1_w_ref[...], ln1_b_ref[...])                 # (T, C)

    # One fused lane-dense (T, C) @ (C, 3C) matmul; RoPE and 1/sqrt(hd)
    # already folded into the Q/K columns in the wrapper.
    qkv = jnp.dot(h, wqkv_ref[...],
                  preferred_element_type=jnp.float32) + bqkv_ref[...]  # (T, 3C)

    # Form heads once: (T, 3C) -> (3H, T, hd); then cheap leading-dim slices.
    qkv_h = jnp.transpose(qkv.reshape(T, 3 * H, HD), (1, 0, 2))
    q = qkv_h[0:H]                            # (H, T, hd), RoPE+scale applied
    k = qkv_h[H:2 * H]                        # (H, T, hd), RoPE applied
    v = qkv_h[2 * H:3 * H]                    # (H, T, hd)

    # causal mask, built once per invocation
    row = lax.broadcasted_iota(jnp.int32, (T, T), 0)
    col = lax.broadcasted_iota(jnp.int32, (T, T), 1)
    causal = (col <= row)[None, :, :]                                  # (1,T,T)

    s = jnp.einsum('htd,hsd->hts', q, k,
                   preferred_element_type=jnp.float32)                 # (H,T,T)
    s = jnp.where(causal, s, NEG_INF)
    s = s - jnp.max(s, axis=-1, keepdims=True)
    p = jnp.exp(s)
    p = p * pl.reciprocal(jnp.sum(p, axis=-1, keepdims=True), approx=True)

    y = jnp.einsum('hts,hsd->htd', p, v,
                   preferred_element_type=jnp.float32)                 # (H,T,hd)

    # head-concat fused into c_proj: one flat (T, C) @ (C, C) MXU op (K = C)
    y_flat = jnp.transpose(y, (1, 0, 2)).reshape(T, C)
    y_proj = jnp.dot(y_flat, wproj_ref[...],
                     preferred_element_type=jnp.float32)               # (T, C)

    x1 = x + y_proj + bproj_ref[...]                                   # residual

    # ---- MLP branch: ln_2 -> c_fc -> gelu(tanh) -> c_proj
    h2 = _layernorm(x1, ln2_w_ref[...], ln2_b_ref[...])
    f = jnp.dot(h2, wfc_ref[...],
                preferred_element_type=jnp.float32) + bfc_ref[...]
    f = _gelu_tanh(f)
    m = jnp.dot(f, wfcp_ref[...],
                preferred_element_type=jnp.float32) + bfcp_ref[...]

    o_ref[...] = x1 + m
    # TODO(synk): at real GPT-2 sizes (C=768, T=1024, B=8) cast MXU operands to
    # bf16 (keep f32 accumulation), row-tile B*T with flash-style attention so
    # activations fit v7x's 64 MiB VMEM, pick 128-(v5e)/256-(v6e/v7x) aligned
    # M/N tiles, and set vmem_limit_bytes explicitly; at C=32 these are noise.


# ------------------------------- wrapper --------------------------------------
def rope_sin_cos(n_pos, head_dim):
    inv_freq = 1.0 / (10000.0 ** (jnp.arange(0, head_dim, 2, dtype=jnp.float32)
                                  / head_dim))
    pos = jnp.arange(n_pos, dtype=jnp.float32)
    freqs = jnp.einsum("i,j->ij", pos, inv_freq)
    emb = jnp.concatenate([freqs, freqs], axis=-1)
    return jnp.sin(emb), jnp.cos(emb)


def _rot_cols(w):
    """rotate_half applied along the head-dim (last) axis."""
    w1, w2 = jnp.split(w, 2, axis=-1)
    return jnp.concatenate([-w2, w1], axis=-1)


def _const_spec(a):
    """Full-array block with a constant index_map: DMA'd once, resident."""
    nd = a.ndim
    return pl.BlockSpec(a.shape, lambda b, _nd=nd: (0,) * _nd)


@jax.jit
def block_forward(x, ln1_w, ln1_b, w_attn, b_attn, w_proj, b_proj,
                  ln2_w, ln2_b, w_fc, b_fc, w_fcp, b_fcp, sin, cos):
    B, T, C = x.shape
    H, HD = N_HEAD, HEAD_DIM
    scale = 1.0 / math.sqrt(HD)

    wq, wk, wv = w_attn[:, 0:C], w_attn[:, C:2 * C], w_attn[:, 2 * C:3 * C]
    bq, bk, bv = b_attn[0:C], b_attn[C:2 * C], b_attn[2 * C:3 * C]

    # Fold RoPE into the Q/K projections (sin/cos constant over time — they
    # depend only on the head index in this module) plus the attention scale
    # (folded into Q only), then re-fuse into ONE (C, 3C) QKV weight:
    #   q_rot = (x@W+b)*cos + rotate_half(x@W+b)*sin
    #         = x @ (W*cos + rot_cols(W)*sin) + (b*cos + rot(b)*sin)
    def fold(w2d, bvec, sc):
        w3 = w2d.reshape(C, H, HD)                                  # (C, H, hd)
        w_eff = (w3 * cos[None] + _rot_cols(w3) * sin[None]) * sc
        b2 = bvec.reshape(H, HD)
        b_eff = (b2 * cos + _rot_cols(b2) * sin) * sc
        return w_eff.reshape(C, C), b_eff.reshape(C)

    wq_eff, bq_eff = fold(wq, bq, scale)
    wk_eff, bk_eff = fold(wk, bk, 1.0)

    w_qkv = jnp.concatenate([wq_eff, wk_eff, wv], axis=1)           # (C, 3C)
    b_qkv = jnp.concatenate([bq_eff, bk_eff, bv])[None, :]          # (1, 3C)

    # lane-dense (1, N) layout for all small vectors
    ln1_w2, ln1_b2 = ln1_w[None, :], ln1_b[None, :]
    ln2_w2, ln2_b2 = ln2_w[None, :], ln2_b[None, :]
    b_proj2, b_fc2, b_fcp2 = b_proj[None, :], b_fc[None, :], b_fcp[None, :]

    weight_args = (ln1_w2, ln1_b2, w_qkv, b_qkv, w_proj, b_proj2,
                   ln2_w2, ln2_b2, w_fc, b_fc2, w_fcp, b_fcp2)

    in_specs = [pl.BlockSpec((None, T, C), lambda b: (b, 0, 0))]      # x slab
    in_specs += [_const_spec(a) for a in weight_args]                 # resident

    return pl.pallas_call(
        block_kernel,
        out_shape=jax.ShapeDtypeStruct((B, T, C), x.dtype),
        grid=(B,),
        in_specs=in_specs,
        out_specs=pl.BlockSpec((None, T, C), lambda b: (b, 0, 0)),
        compiler_params=pltpu.CompilerParams(
            dimension_semantics=("parallel",)),   # shards across TCs on v7x
    )(x, *weight_args)


# ---------------------------- pure-JAX reference ------------------------------
def block_ref(x, ln1_w, ln1_b, w_attn, b_attn, w_proj, b_proj,
              ln2_w, ln2_b, w_fc, b_fc, w_fcp, b_fcp, sin, cos):
    B, T, C = x.shape

    def ln(u, w, b):
        mu = u.mean(-1, keepdims=True)
        var = ((u - mu) ** 2).mean(-1, keepdims=True)
        return (u - mu) / jnp.sqrt(var + LN_EPS) * w + b

    def rot(u):
        u1, u2 = jnp.split(u, 2, axis=-1)
        return jnp.concatenate([-u2, u1], axis=-1)

    h = ln(x, ln1_w, ln1_b)
    qkv = h @ w_attn + b_attn
    q, k, v = jnp.split(qkv, 3, axis=-1)
    q = q.reshape(B, T, N_HEAD, HEAD_DIM).transpose(0, 2, 1, 3)
    k = k.reshape(B, T, N_HEAD, HEAD_DIM).transpose(0, 2, 1, 3)
    v = v.reshape(B, T, N_HEAD, HEAD_DIM).transpose(0, 2, 1, 3)
    s = sin[None, :, None, :]
    c = cos[None, :, None, :]
    q = q * c + rot(q) * s
    k = k * c + rot(k) * s
    att = jnp.einsum("bhtd,bhsd->bhts", q, k) / math.sqrt(HEAD_DIM)
    mask = jnp.tril(jnp.ones((T, T), dtype=bool))
    att = jnp.where(mask, att, -jnp.inf)
    att = jax.nn.softmax(att, axis=-1)
    y = jnp.einsum("bhts,bhsd->bhtd", att, v)
    y = y.transpose(0, 2, 1, 3).reshape(B, T, C)
    x = x + y @ w_proj + b_proj
    h2 = ln(x, ln2_w, ln2_b)
    f = h2 @ w_fc + b_fc
    f = 0.5 * f * (1.0 + jnp.tanh(math.sqrt(2.0 / math.pi) * (f + 0.044715 * f ** 3)))
    return x + f @ w_fcp + b_fcp


# ----------------------------------- main -------------------------------------
if __name__ == "__main__":
    key = jax.random.PRNGKey(0)
    ks = jax.random.split(key, 12)

    x = jax.random.normal(ks[0], (BATCH, SEQ, N_EMBD), jnp.float32)

    ln1_w = 1.0 + 0.1 * jax.random.normal(ks[1], (N_EMBD,), jnp.float32)
    ln1_b = 0.1 * jax.random.normal(ks[2], (N_EMBD,), jnp.float32)
    ln2_w = 1.0 + 0.1 * jax.random.normal(ks[3], (N_EMBD,), jnp.float32)
    ln2_b = 0.1 * jax.random.normal(ks[4], (N_EMBD,), jnp.float32)

    w_attn = 0.02 * jax.random.normal(ks[5], (N_EMBD, 3 * N_EMBD), jnp.float32)
    b_attn = 0.01 * jax.random.normal(ks[6], (3 * N_EMBD,), jnp.float32)
    w_proj = 0.02 * jax.random.normal(ks[7], (N_EMBD, N_EMBD), jnp.float32)
    b_proj = 0.01 * jax.random.normal(ks[8], (N_EMBD,), jnp.float32)
    w_fc = 0.02 * jax.random.normal(ks[9], (N_EMBD, 4 * N_EMBD), jnp.float32)
    b_fc = 0.01 * jax.random.normal(ks[10], (4 * N_EMBD,), jnp.float32)
    w_fcp = 0.02 * jax.random.normal(ks[11], (4 * N_EMBD, N_EMBD), jnp.float32)
    b_fcp = jnp.zeros((N_EMBD,), jnp.float32)

    # sin/cos indexed by head (faithfully reproduces the reference's use of
    # the head axis as the rotary "position" axis).
    sin, cos = rope_sin_cos(N_HEAD, HEAD_DIM)

    args = (x, ln1_w, ln1_b, w_attn, b_attn, w_proj, b_proj,
            ln2_w, ln2_b, w_fc, b_fc, w_fcp, b_fcp, sin, cos)

    out = block_forward(*args)
    out = jax.block_until_ready(out)

    ref = block_ref(*args)
    assert out.shape == (BATCH, SEQ, N_EMBD)
    assert jnp.allclose(out, ref, atol=2e-3, rtol=2e-3), "mismatch vs reference"

    print("KERNEL_OK")
</pallas_src>

<mosaic_0001>
module attributes {stable_mosaic.version = 11 : i64} {
  func.func @block_kernel(%arg0: i32, %arg1: memref<1x8x32xf32, #tpu.memory_space<vmem>>, %arg2: memref<1x32xf32, #tpu.memory_space<vmem>>, %arg3: memref<1x32xf32, #tpu.memory_space<vmem>>, %arg4: memref<32x96xf32, #tpu.memory_space<vmem>>, %arg5: memref<1x96xf32, #tpu.memory_space<vmem>>, %arg6: memref<32x32xf32, #tpu.memory_space<vmem>>, %arg7: memref<1x32xf32, #tpu.memory_space<vmem>>, %arg8: memref<1x32xf32, #tpu.memory_space<vmem>>, %arg9: memref<1x32xf32, #tpu.memory_space<vmem>>, %arg10: memref<32x128xf32, #tpu.memory_space<vmem>>, %arg11: memref<1x128xf32, #tpu.memory_space<vmem>>, %arg12: memref<128x32xf32, #tpu.memory_space<vmem>>, %arg13: memref<1x32xf32, #tpu.memory_space<vmem>>, %arg14: memref<1x8x32xf32, #tpu.memory_space<vmem>>) attributes {dimension_semantics = [#tpu.dimension_semantics<parallel>], iteration_bounds = array<i64: 2>, scalar_prefetch = 0 : i64, scratch_operands = 0 : i64, tpu.core_type = #tpu.core_type<tc>, window_params = [{transform_indices = @transform_0, window_bounds = array<i64: 1, 8, 32>}, {pipeline_mode = #tpu.pipeline_mode<synchronous>, transform_indices = @transform_1, window_bounds = array<i64: 1, 32>}, {pipeline_mode = #tpu.pipeline_mode<synchronous>, transform_indices = @transform_2, window_bounds = array<i64: 1, 32>}, {pipeline_mode = #tpu.pipeline_mode<synchronous>, transform_indices = @transform_3, window_bounds = array<i64: 32, 96>}, {pipeline_mode = #tpu.pipeline_mode<synchronous>, transform_indices = @transform_4, window_bounds = array<i64: 1, 96>}, {pipeline_mode = #tpu.pipeline_mode<synchronous>, transform_indices = @transform_5, window_bounds = array<i64: 32, 32>}, {pipeline_mode = #tpu.pipeline_mode<synchronous>, transform_indices = @transform_6, window_bounds = array<i64: 1, 32>}, {pipeline_mode = #tpu.pipeline_mode<synchronous>, transform_indices = @transform_7, window_bounds = array<i64: 1, 32>}, {pipeline_mode = #tpu.pipeline_mode<synchronous>, transform_indices = @transform_8, window_bounds = array<i64: 1, 32>}, {pipeline_mode = #tpu.pipeline_mode<synchronous>, transform_indices = @transform_9, window_bounds = array<i64: 32, 128>}, {pipeline_mode = #tpu.pipeline_mode<synchronous>, transform_indices = @transform_10, window_bounds = array<i64: 1, 128>}, {pipeline_mode = #tpu.pipeline_mode<synchronous>, transform_indices = @transform_11, window_bounds = array<i64: 128, 32>}, {pipeline_mode = #tpu.pipeline_mode<synchronous>, transform_indices = @transform_12, window_bounds = array<i64: 1, 32>}, {transform_indices = @transform_13, window_bounds = array<i64: 1, 8, 32>}]} {
    %c0 = arith.constant 0 : index
    %c0_0 = arith.constant 0 : index
    %c0_1 = arith.constant 0 : index
    %0 = vector.load %arg1[%c0, %c0_0, %c0_1] : memref<1x8x32xf32, #tpu.memory_space<vmem>>, vector<1x8x32xf32>
    %1 = vector.shape_cast %0 : vector<1x8x32xf32> to vector<8x32xf32>
    %c0_2 = arith.constant 0 : index
    %c0_3 = arith.constant 0 : index
    %2 = vector.load %arg2[%c0_2, %c0_3] : memref<1x32xf32, #tpu.memory_space<vmem>>, vector<1x32xf32>
    %c0_4 = arith.constant 0 : index
    %c0_5 = arith.constant 0 : index
    %3 = vector.load %arg3[%c0_4, %c0_5] : memref<1x32xf32, #tpu.memory_space<vmem>>, vector<1x32xf32>
    %cst = arith.constant dense<0.000000e+00> : vector<8xf32>
    %4 = vector.multi_reduction <add>, %1, %cst [1] : vector<8x32xf32> to vector<8xf32>
    %5 = vector.shape_cast %4 : vector<8xf32> to vector<8x1xf32>
    %cst_6 = arith.constant 3.200000e+01 : f32
    %6 = vector.broadcast %cst_6 : f32 to vector<8x1xf32>
    %7 = arith.divf %5, %6 : vector<8x1xf32>
    %8 = vector.broadcast %7 : vector<8x1xf32> to vector<8x32xf32>
    %9 = arith.subf %1, %8 : vector<8x32xf32>
    %10 = arith.mulf %9, %9 : vector<8x32xf32>
    %cst_7 = arith.constant dense<0.000000e+00> : vector<8xf32>
    %11 = vector.multi_reduction <add>, %10, %cst_7 [1] : vector<8x32xf32> to vector<8xf32>
    %12 = vector.shape_cast %11 : vector<8xf32> to vector<8x1xf32>
    %cst_8 = arith.constant 3.200000e+01 : f32
    %13 = vector.broadcast %cst_8 : f32 to vector<8x1xf32>
    %14 = arith.divf %12, %13 : vector<8x1xf32>
    %15 = vector.broadcast %7 : vector<8x1xf32> to vector<8x32xf32>
    %16 = arith.subf %1, %15 : vector<8x32xf32>
    %cst_9 = arith.constant 9.99999974E-6 : f32
    %17 = vector.broadcast %cst_9 : f32 to vector<8x1xf32>
    %18 = arith.addf %14, %17 : vector<8x1xf32>
    %19 = math.rsqrt %18 : vector<8x1xf32>
    %20 = vector.broadcast %19 : vector<8x1xf32> to vector<8x32xf32>
    %21 = arith.mulf %16, %20 : vector<8x32xf32>
    %22 = vector.broadcast %2 : vector<1x32xf32> to vector<8x32xf32>
    %23 = arith.mulf %21, %22 : vector<8x32xf32>
    %24 = vector.broadcast %3 : vector<1x32xf32> to vector<8x32xf32>
    %25 = arith.addf %23, %24 : vector<8x32xf32>
    %c0_10 = arith.constant 0 : index
    %c0_11 = arith.constant 0 : index
    %26 = vector.load %arg4[%c0_10, %c0_11] : memref<32x96xf32, #tpu.memory_space<vmem>>, vector<32x96xf32>
    %cst_12 = arith.constant dense<0.000000e+00> : vector<8x96xf32>
    %27 = tpu.matmul %25, %26, %cst_12 {dimension_numbers = #tpu.dot_dimension_numbers<[1], [0], [0], [1], [0, 0, 1, 1], [], []>} : vector<8x32xf32>, vector<32x96xf32>, vector<8x96xf32> -> vector<8x96xf32>
    %c0_13 = arith.constant 0 : index
    %c0_14 = arith.constant 0 : index
    %28 = vector.load %arg5[%c0_13, %c0_14] : memref<1x96xf32, #tpu.memory_space<vmem>>, vector<1x96xf32>
    %29 = vector.broadcast %28 : vector<1x96xf32> to vector<8x96xf32>
    %30 = arith.addf %27, %29 : vector<8x96xf32>
    %31 = vector.shape_cast %30 : vector<8x96xf32> to vector<8x12x8xf32>
    %32 = tpu.transpose %31, [1, 0, 2] : vector<8x12x8xf32> -> vector<12x8x8xf32>
    %33 = vector.extract_strided_slice %32 {offsets = [0, 0, 0], sizes = [4, 8, 8], strides = [1, 1, 1]} : vector<12x8x8xf32> to vector<4x8x8xf32>
    %34 = vector.extract_strided_slice %32 {offsets = [4, 0, 0], sizes = [4, 8, 8], strides = [1, 1, 1]} : vector<12x8x8xf32> to vector<4x8x8xf32>
    %35 = vector.extract_strided_slice %32 {offsets = [8, 0, 0], sizes = [4, 8, 8], strides = [1, 1, 1]} : vector<12x8x8xf32> to vector<4x8x8xf32>
    %36 = tpu.iota {dimensions = array<i32: 0>} : vector<8x8xi32>
    %37 = tpu.iota {dimensions = array<i32: 1>} : vector<8x8xi32>
    %38 = arith.cmpi sle, %37, %36 : vector<8x8xi32>
    %39 = vector.shape_cast %38 : vector<8x8xi1> to vector<1x8x8xi1>
    "tpu.trace_start"() <{level = 10 : i32, message = "htd,hsd->hts"}> : () -> ()
    %cst_15 = arith.constant dense<0.000000e+00> : vector<4x8x8xf32>
    %40 = tpu.matmul %33, %34, %cst_15 {dimension_numbers = #tpu.dot_dimension_numbers<[2], [2], [1], [1], [0, 0, 0, 1, 1, 1], [0], [0]>} : vector<4x8x8xf32>, vector<4x8x8xf32>, vector<4x8x8xf32> -> vector<4x8x8xf32>
    %cst_16 = arith.constant -1.000000e+30 : f32
    "tpu.trace_stop"() : () -> ()
    %41 = vector.shape_cast %39 : vector<1x8x8xi1> to vector<1x8x8xi1>
    %42 = vector.broadcast %41 : vector<1x8x8xi1> to vector<4x8x8xi1>
    %43 = vector.broadcast %cst_16 : f32 to vector<4x8x8xf32>
    %44 = arith.select %42, %40, %43 : vector<4x8x8xi1>, vector<4x8x8xf32>
    %cst_17 = arith.constant dense<0xFF800000> : vector<4x8xf32>
    %45 = vector.multi_reduction <maximumf>, %44, %cst_17 [2] : vector<4x8x8xf32> to vector<4x8xf32>
    %46 = vector.shape_cast %45 : vector<4x8xf32> to vector<4x8x1xf32>
    %47 = vector.broadcast %46 : vector<4x8x1xf32> to vector<4x8x8xf32>
    %48 = arith.subf %44, %47 : vector<4x8x8xf32>
    %49 = math.exp %48 : vector<4x8x8xf32>
    %cst_18 = arith.constant dense<0.000000e+00> : vector<4x8xf32>
    %50 = vector.multi_reduction <add>, %49, %cst_18 [2] : vector<4x8x8xf32> to vector<4x8xf32>
    %51 = vector.shape_cast %50 : vector<4x8xf32> to vector<4x8x1xf32>
    %52 = tpu.reciprocal %51 {approx = true} : vector<4x8x1xf32> -> vector<4x8x1xf32>
    %53 = vector.broadcast %52 : vector<4x8x1xf32> to vector<4x8x8xf32>
    %54 = arith.mulf %49, %53 : vector<4x8x8xf32>
    "tpu.trace_start"() <{level = 10 : i32, message = "hts,hsd->htd"}> : () -> ()
    %cst_19 = arith.constant dense<0.000000e+00> : vector<4x8x8xf32>
    %55 = tpu.matmul %54, %35, %cst_19 {dimension_numbers = #tpu.dot_dimension_numbers<[2], [1], [1], [2], [0, 0, 0, 1, 1, 2], [0], [0]>} : vector<4x8x8xf32>, vector<4x8x8xf32>, vector<4x8x8xf32> -> vector<4x8x8xf32>
    "tpu.trace_stop"() : () -> ()
    %56 = tpu.transpose %55, [1, 0, 2] : vector<4x8x8xf32> -> vector<8x4x8xf32>
    %57 = vector.shape_cast %56 : vector<8x4x8xf32> to vector<8x32xf32>
    %c0_20 = arith.constant 0 : index
    %c0_21 = arith.constant 0 : index
    %58 = vector.load %arg6[%c0_20, %c0_21] : memref<32x32xf32, #tpu.memory_space<vmem>>, vector<32x32xf32>
    %cst_22 = arith.constant dense<0.000000e+00> : vector<8x32xf32>
    %59 = tpu.matmul %57, %58, %cst_22 {dimension_numbers = #tpu.dot_dimension_numbers<[1], [0], [0], [1], [0, 0, 1, 1], [], []>} : vector<8x32xf32>, vector<32x32xf32>, vector<8x32xf32> -> vector<8x32xf32>
    %60 = arith.addf %1, %59 : vector<8x32xf32>
    %c0_23 = arith.constant 0 : index
    %c0_24 = arith.constant 0 : index
    %61 = vector.load %arg7[%c0_23, %c0_24] : memref<1x32xf32, #tpu.memory_space<vmem>>, vector<1x32xf32>
    %62 = vector.broadcast %61 : vector<1x32xf32> to vector<8x32xf32>
    %63 = arith.addf %60, %62 : vector<8x32xf32>
    %c0_25 = arith.constant 0 : index
    %c0_26 = arith.constant 0 : index
    %64 = vector.load %arg8[%c0_25, %c0_26] : memref<1x32xf32, #tpu.memory_space<vmem>>, vector<1x32xf32>
    %c0_27 = arith.constant 0 : index
    %c0_28 = arith.constant 0 : index
    %65 = vector.load %arg9[%c0_27, %c0_28] : memref<1x32xf32, #tpu.memory_space<vmem>>, vector<1x32xf32>
    %cst_29 = arith.constant dense<0.000000e+00> : vector<8xf32>
    %66 = vector.multi_reduction <add>, %63, %cst_29 [1] : vector<8x32xf32> to vector<8xf32>
    %67 = vector.shape_cast %66 : vector<8xf32> to vector<8x1xf32>
    %cst_30 = arith.constant 3.200000e+01 : f32
    %68 = vector.broadcast %cst_30 : f32 to vector<8x1xf32>
    %69 = arith.divf %67, %68 : vector<8x1xf32>
    %70 = vector.broadcast %69 : vector<8x1xf32> to vector<8x32xf32>
    %71 = arith.subf %63, %70 : vector<8x32xf32>
    %72 = arith.mulf %71, %71 : vector<8x32xf32>
    %cst_31 = arith.constant dense<0.000000e+00> : vector<8xf32>
    %73 = vector.multi_reduction <add>, %72, %cst_31 [1] : vector<8x32xf32> to vector<8xf32>
    %74 = vector.shape_cast %73 : vector<8xf32> to vector<8x1xf32>
    %cst_32 = arith.constant 3.200000e+01 : f32
    %75 = vector.broadcast %cst_32 : f32 to vector<8x1xf32>
    %76 = arith.divf %74, %75 : vector<8x1xf32>
    %77 = vector.broadcast %69 : vector<8x1xf32> to vector<8x32xf32>
    %78 = arith.subf %63, %77 : vector<8x32xf32>
    %cst_33 = arith.constant 9.99999974E-6 : f32
    %79 = vector.broadcast %cst_33 : f32 to vector<8x1xf32>
    %80 = arith.addf %76, %79 : vector<8x1xf32>
    %81 = math.rsqrt %80 : vector<8x1xf32>
    %82 = vector.broadcast %81 : vector<8x1xf32> to vector<8x32xf32>
    %83 = arith.mulf %78, %82 : vector<8x32xf32>
    %84 = vector.broadcast %64 : vector<1x32xf32> to vector<8x32xf32>
    %85 = arith.mulf %83, %84 : vector<8x32xf32>
    %86 = vector.broadcast %65 : vector<1x32xf32> to vector<8x32xf32>
    %87 = arith.addf %85, %86 : vector<8x32xf32>
    %c0_34 = arith.constant 0 : index
    %c0_35 = arith.constant 0 : index
    %88 = vector.load %arg10[%c0_34, %c0_35] : memref<32x128xf32, #tpu.memory_space<vmem>>, vector<32x128xf32>
    %cst_36 = arith.constant dense<0.000000e+00> : vector<8x128xf32>
    %89 = tpu.matmul %87, %88, %cst_36 {dimension_numbers = #tpu.dot_dimension_numbers<[1], [0], [0], [1], [0, 0, 1, 1], [], []>} : vector<8x32xf32>, vector<32x128xf32>, vector<8x128xf32> -> vector<8x128xf32>
    %c0_37 = arith.constant 0 : index
    %c0_38 = arith.constant 0 : index
    %90 = vector.load %arg11[%c0_37, %c0_38] : memref<1x128xf32, #tpu.memory_space<vmem>>, vector<1x128xf32>
    %91 = vector.broadcast %90 : vector<1x128xf32> to vector<8x128xf32>
    %92 = arith.addf %89, %91 : vector<8x128xf32>
    %cst_39 = arith.constant 5.000000e-01 : f32
    %93 = vector.broadcast %cst_39 : f32 to vector<8x128xf32>
    %94 = arith.mulf %93, %92 : vector<8x128xf32>
    %cst_40 = arith.constant 4.471500e-02 : f32
    %95 = vector.broadcast %cst_40 : f32 to vector<8x128xf32>
    %96 = arith.mulf %95, %92 : vector<8x128xf32>
    %97 = arith.mulf %96, %92 : vector<8x128xf32>
    %98 = arith.mulf %97, %92 : vector<8x128xf32>
    %99 = arith.addf %92, %98 : vector<8x128xf32>
    %cst_41 = arith.constant 0.797884583 : f32
    %100 = vector.broadcast %cst_41 : f32 to vector<8x128xf32>
    %101 = arith.mulf %100, %99 : vector<8x128xf32>
    %102 = math.tanh %101 : vector<8x128xf32>
    %cst_42 = arith.constant 1.000000e+00 : f32
    %103 = vector.broadcast %cst_42 : f32 to vector<8x128xf32>
    %104 = arith.addf %103, %102 : vector<8x128xf32>
    %105 = arith.mulf %94, %104 : vector<8x128xf32>
    %c0_43 = arith.constant 0 : index
    %c0_44 = arith.constant 0 : index
    %106 = vector.load %arg12[%c0_43, %c0_44] : memref<128x32xf32, #tpu.memory_space<vmem>>, vector<128x32xf32>
    %cst_45 = arith.constant dense<0.000000e+00> : vector<8x32xf32>
    %107 = tpu.matmul %105, %106, %cst_45 {dimension_numbers = #tpu.dot_dimension_numbers<[1], [0], [0], [1], [0, 0, 1, 1], [], []>} : vector<8x128xf32>, vector<128x32xf32>, vector<8x32xf32> -> vector<8x32xf32>
    %c0_46 = arith.constant 0 : index
    %c0_47 = arith.constant 0 : index
    %108 = vector.load %arg13[%c0_46, %c0_47] : memref<1x32xf32, #tpu.memory_space<vmem>>, vector<1x32xf32>
    %109 = vector.broadcast %108 : vector<1x32xf32> to vector<8x32xf32>
    %110 = arith.addf %107, %109 : vector<8x32xf32>
    %111 = arith.addf %63, %110 : vector<8x32xf32>
    %c0_48 = arith.constant 0 : index
    %c0_49 = arith.constant 0 : index
    %c0_50 = arith.constant 0 : index
    %112 = vector.load %arg14[%c0_48, %c0_49, %c0_50] : memref<1x8x32xf32, #tpu.memory_space<vmem>>, vector<1x8x32xf32>
    %113 = vector.shape_cast %112 : vector<1x8x32xf32> to vector<8x32xf32>
    %114 = vector.shape_cast %111 : vector<8x32xf32> to vector<1x8x32xf32>
    tpu.vector_store %arg14[%c0_48, %c0_49, %c0_50], %114 {strides = array<i32>} : memref<1x8x32xf32, #tpu.memory_space<vmem>>, vector<1x8x32xf32>,
    return
  }
  func.func @transform_0(%arg0: i32) -> (i32, i32, i32) {
    %c0_i32 = arith.constant 0 : i32
    %c0_i32_0 = arith.constant 0 : i32
    %c0_i32_1 = arith.constant 0 : i32
    return %arg0, %c0_i32, %c0_i32_0 : i32, i32, i32
  }
  func.func @transform_1(%arg0: i32) -> (i32, i32) {
    %c0_i32 = arith.constant 0 : i32
    %c0_i32_0 = arith.constant 0 : i32
    %c0_i32_1 = arith.constant 0 : i32
    return %c0_i32, %c0_i32_0 : i32, i32
  }
  func.func @transform_2(%arg0: i32) -> (i32, i32) {
    %c0_i32 = arith.constant 0 : i32
    %c0_i32_0 = arith.constant 0 : i32
    %c0_i32_1 = arith.constant 0 : i32
    return %c0_i32, %c0_i32_0 : i32, i32
  }
  func.func @transform_3(%arg0: i32) -> (i32, i32) {
    %c0_i32 = arith.constant 0 : i32
    %c0_i32_0 = arith.constant 0 : i32
    %c0_i32_1 = arith.constant 0 : i32
    return %c0_i32, %c0_i32_0 : i32, i32
  }
  func.func @transform_4(%arg0: i32) -> (i32, i32) {
    %c0_i32 = arith.constant 0 : i32
    %c0_i32_0 = arith.constant 0 : i32
    %c0_i32_1 = arith.constant 0 : i32
    return %c0_i32, %c0_i32_0 : i32, i32
  }
  func.func @transform_5(%arg0: i32) -> (i32, i32) {
    %c0_i32 = arith.constant 0 : i32
    %c0_i32_0 = arith.constant 0 : i32
    %c0_i32_1 = arith.constant 0 : i32
    return %c0_i32, %c0_i32_0 : i32, i32
  }
  func.func @transform_6(%arg0: i32) -> (i32, i32) {
    %c0_i32 = arith.constant 0 : i32
    %c0_i32_0 = arith.constant 0 : i32
    %c0_i32_1 = arith.constant 0 : i32
    return %c0_i32, %c0_i32_0 : i32, i32
  }
  func.func @transform_7(%arg0: i32) -> (i32, i32) {
    %c0_i32 = arith.constant 0 : i32
    %c0_i32_0 = arith.constant 0 : i32
    %c0_i32_1 = arith.constant 0 : i32
    return %c0_i32, %c0_i32_0 : i32, i32
  }
  func.func @transform_8(%arg0: i32) -> (i32, i32) {
    %c0_i32 = arith.constant 0 : i32
    %c0_i32_0 = arith.constant 0 : i32
    %c0_i32_1 = arith.constant 0 : i32
    return %c0_i32, %c0_i32_0 : i32, i32
  }
  func.func @transform_9(%arg0: i32) -> (i32, i32) {
    %c0_i32 = arith.constant 0 : i32
    %c0_i32_0 = arith.constant 0 : i32
    %c0_i32_1 = arith.constant 0 : i32
    return %c0_i32, %c0_i32_0 : i32, i32
  }
  func.func @transform_10(%arg0: i32) -> (i32, i32) {
    %c0_i32 = arith.constant 0 : i32
    %c0_i32_0 = arith.constant 0 : i32
    %c0_i32_1 = arith.constant 0 : i32
    return %c0_i32, %c0_i32_0 : i32, i32
  }
  func.func @transform_11(%arg0: i32) -> (i32, i32) {
    %c0_i32 = arith.constant 0 : i32
    %c0_i32_0 = arith.constant 0 : i32
    %c0_i32_1 = arith.constant 0 : i32
    return %c0_i32, %c0_i32_0 : i32, i32
  }
  func.func @transform_12(%arg0: i32) -> (i32, i32) {
    %c0_i32 = arith.constant 0 : i32
    %c0_i32_0 = arith.constant 0 : i32
    %c0_i32_1 = arith.constant 0 : i32
    return %c0_i32, %c0_i32_0 : i32, i32
  }
  func.func @transform_13(%arg0: i32) -> (i32, i32, i32) {
    %c0_i32 = arith.constant 0 : i32
    %c0_i32_0 = arith.constant 0 : i32
    %c0_i32_1 = arith.constant 0 : i32
    return %arg0, %c0_i32, %c0_i32_0 : i32, i32, i32
  }
}

</mosaic_0001>

<bundles_post_ra>
// kernel: block_forward.1
= control target key start
LH: loop header
LB: loop body
LE: loop exit
PB: predicated region body
PF: predicated region fallthrough
CT: control target
= control target key end

     0   :  { %s3064_s0 = inlined_call_operand.vmem [shape: f32[2,8,32], index: 0, kind: input, shape index: {}]   ;;  %s3065_s1 = inlined_call_operand.vmem [shape: f32[1,32], index: 1, kind: input, shape index: {}]   ;;  %s3066_s2 = inlined_call_operand.vmem [shape: f32[1,32], index: 2, kind: input, shape index: {}]   ;;  %s3067_s3 = inlined_call_operand.vmem [shape: f32[32,96], index: 3, kind: input, shape index: {}]   ;;  %s3068_s4 = inlined_call_operand.vmem [shape: f32[1,96], index: 4, kind: input, shape index: {}]   ;;  %s3069_s5 = inlined_call_operand.vmem [shape: f32[32,32], index: 5, kind: input, shape index: {}]   ;;  %s3070_s6 = inlined_call_operand.vmem [shape: f32[1,32], index: 6, kind: input, shape index: {}]   ;;  %s3071_s7 = inlined_call_operand.vmem [shape: f32[1,32], index: 7, kind: input, shape index: {}]   ;;  %s3072_s8 = inlined_call_operand.vmem [shape: f32[1,32], index: 8, kind: input, shape index: {}]   ;;  %s3073_s9 = inlined_call_operand.vmem [shape: f32[32,128], index: 9, kind: input, shape index: {}]   ;;  %s3074_s10 = inlined_call_operand.vmem [shape: f32[1,128], index: 10, kind: input, shape index: {}]   ;;  %s3075_s11 = inlined_call_operand.vmem [shape: f32[128,32], index: 11, kind: input, shape index: {}]   ;;  %s3076_s12 = inlined_call_operand.vmem [shape: f32[1,32], index: 12, kind: input, shape index: {}]   ;;  %s3077_s13 = inlined_call_operand.hbm [shape: f32[2,8,32], index: 13, kind: output, shape index: {}]  }
   0x1   :  { %3078 = sst [smem:[#allocation5_spill]] %s3064_s0 }
   0x2   :  { %3079 = sst [smem:[#allocation6_spill]] %s3065_s1 }
   0x3   :  { %3080 = sst [smem:[#allocation7_spill]] %s3066_s2 }
   0x4   :  { %18 = vsyncpa [#allocation3], 0 }
   0x5   :  { %20 = vsyncpa [#allocation3 + $0x1], 0  ;;  %s2652_s25 = smov 0   ;;  %s2654_s26 = smov 0  }
   0x6   :  { %s2656_s27 = smov 0   ;;  %s2658_s28 = smov 0  }
   0x7 LB: > { %s2673_s29 = sadd.s32 4294967295, %s2560_s28   ;;  %s2175_s30 = sadd.s32 4294967294, %s2560_s28   ;;  %s2560_s28 = sphi %s2658_s28, %s3089_s28   ;;  %s2556_s27 = sphi %s2656_s27, %s3088_s27   ;;  %s2552_s26 = sphi %s2654_s26, %s3087_s26   ;;  %s2548_s25 = sphi %s2652_s25, %s3086_s25  }
   0x8   : > { %s2677_s14 = sadd.s32 1, %s2560_s28   ;;  %s311_s15 = sadd.s32 1, %s2556_s27 }
   0x9   : > { %s308_s16 = ssub.s32 %s2560_s28, %s2677_s14  ;;  %p321_p0 = scmp.ne.s32.totalorder %s2556_s27, %s2552_s26 }
   0xa   : > { %p309_p1 = scmp.eq.s32.totalorder %s308_s16, 0  ;;  %p322_p2 = scmp.eq.s32.totalorder %s2673_s29, 1 }
   0xb   : > { %p327_p3 = scmp.ne.s32.totalorder %s2552_s26, %s2548_s25  ;;  %p328_p4 = scmp.eq.s32.totalorder %s2175_s30, 1 }
   0xc   : > { %s2688_s17 = scalar_select %p309_p1, %s2556_s27, %s311_s15  }
   0xd   : > { %p2690_p5 = por %p322_p2, %p321_p0  ;;  %p2694_p6 = por %p328_p4, %p327_p3 }
   0xe   : > { %p2178_p7 = scmp.ge.s32.totalorder %s2560_s28, 1  ;;  %p389_p8 = scmp.lt.s32.totalorder %s2560_s28, 3 }
  0x10   : > { %p390_p9 = pnand %p2178_p7, %p389_p8 }
  0x11   : > { %p432_p10 = scmp.lt.s32.totalorder (!%p390_p9), %s2673_s29, 1  ;;  %vm439_vm0 = vcmask (!%p390_p9), 261120   ;;  %s3083_s0 = sld [smem:[#allocation5_spill]] (!%p390_p9)  ;;  %v468_v7 = vld [vmem:[%s3067_s3] sm:$0xff] (!%p390_p9)  ;;  %v469_v8 = vld [vmem:[%s3067_s3 + $0x8] sm:$0xff] (!%p390_p9)  ;;  %v470_v9 = vld [vmem:[%s3067_s3 + $0x10] sm:$0xff] (!%p390_p9)  ;;  %v591_v28 = vlaneseq (!%p390_p9) }
  0x12   : > { %393 = sbr.rel (%p390_p9) target bundleno = 2608 (0xa30), region = 72  ;;  %v2562_v10 = vmov (!%p390_p9), 0.0|0.0   ;;  %v2377_v11 = vpack.c.bf16 (!%p390_p9), %v469_v8, %v468_v7  ;;  %v471_v12 = vld [vmem:[%s3067_s3 + $0x18] sm:$0xff] (!%p390_p9)  ;;  %vm2563_vm1 = vmmov (!%p390_p9), 0   ;;  %v2564_v13 = vmov (!%p390_p9), 0.0   ;;  %s3084_s1 = sld [smem:[#allocation6_spill]] (!%p390_p9) }
  0x13   : > { %2376 = vmatprep.subr.bf16.mxu1 (!%p390_p9), %v2562_v10  ;;  %2276 = vmatprep.mubr.msk.f32.mxu1 (!%p390_p9), %vm2563_vm1, %v2564_v13  ;;  %v2380_v14 = vpack.c.bf16 (!%p390_p9), %v471_v12, %v470_v9  ;;  %s3085_s2 = sld [smem:[#allocation7_spill]] (!%p390_p9)  ;;  %v2183_v24 = vld [vmem:[%s3068_s4] ss:$0 sm:$0xff] (!%p390_p9)  ;;  %s2565_s23 = smov (!%p390_p9), 80   ;;  %v2752_v29 = vshrl.u32 (!%p390_p9), %v591_v28, 7  ;;  %v2754_v30 = vand.u32 (!%p390_p9), 127, %v591_v28 }
  0x14   : > { %2289 = vmatprep.subr.mxu0 (!%p390_p9), %v2564_v13  ;;  %2291 = vmatprep.mubr.msk.f32.mxu0 (!%p390_p9), %vm2563_vm1, %v2564_v13  ;;  %s2567_s30 = smov (!%p390_p9), 88   ;;  %s2568_s15 = smov (!%p390_p9), 72   ;;  %v2572_v31 = vmov (!%p390_p9), 1983009808   ;;  %v2573_v34 = vmov (!%p390_p9), 1934713408  }
  0x15   : > { %2378 = vmatpush3.bf16.msra.mxu1 (!%p390_p9), %v2377_v11  ;;  %s2569_s16 = smov (!%p390_p9), 120   ;;  %vm998_vm2 = vcmp.le.s32.totalorder (!%p390_p9), %v2754_v30, %v2752_v29  ;;  %v589_v32 = vunpack.c.l.s4 (!%p390_p9), %v2572_v31  ;;  %v653_v35 = vunpack.c.l.s4 (!%p390_p9), %v2573_v34  ;;  %vm999_vm3 = vcmask (!%p390_p9), 64512   ;;  %s2574_s22 = smov (!%p390_p9), 64  }
  0x16   : > { %2379 = vmatprep.subr.bf16.mxu1 (!%p390_p9), %v2562_v10  ;;  %vm1795_vm4 = vcmask (!%p390_p9), 130048   ;;  %vm1797_vm5 = vcmask (!%p390_p9), 195584  }
  0x17   : > { %v590_v36 = vunpack.c.0.s8 (!%p390_p9), %v589_v32  ;;  %v654_v39 = vunpack.c.0.s8 (!%p390_p9), %v653_v35 }
  0x18   : > { %v2181_v19 = vld [vmem:[%s3084_s1] ss:$0 sm:$0xff] (!%p390_p9) }
  0x19   : > { %s433_s20 = scalar_select %p432_p10, %s2673_s29, 1  ;;  %2381 = vmatpush3.bf16.msra.mxu1 %v2380_v14  ;;  %v2182_v21 = vld [vmem:[%s3085_s2] ss:$0 sm:$0xff]  ;;  %v2759_v40 = vsub.s32 %v590_v36, %v2752_v29  ;;  %v2762_v46 = vsub.s32 %v654_v39, %v2752_v29 }
  0x1a   : > { %2279 = vmatprep.subr.mxu1 %v2564_v13 }
  0x1b   : > { %s2180_s21 = sshll.u32 %s433_s20, 3  ;;  %s2570_s20 = smov 112  }
  0x1c   : > { %s435_s24 = scalar_lea.vmem %s3083_s0, %s2180_s21  ;;  %s2571_s21 = smov 104  }
  0x1d   : > { %v2705_v0 = vld [vmem:[%s435_s24] sm:$0xff]  ;;  %s2566_s24 = smov 96  }
  0x1e   : > { %v440_v1 = vsel %vm439_vm0, %v2705_v0, 0.0 }
  0x1f   : > { %441 = vadd.xlane.f32.xlu0 %v440_v1 }
  0xac   : > { %v442_v2 = vpop.xlane.xlu0 %441 }
  0xad   : > { %v444_v3 = vmul.f32 0.03125, %v442_v2 }
  0xaf   : > { %v445_v4 = vsub.f32 %v2705_v0, %v444_v3 }
  0xb1   : > { %v446_v5 = vmul.f32 %v445_v4, %v445_v4 }
  0xb3   : > { %v447_v6 = vsel %vm439_vm0, %v446_v5, 0.0 }
  0xb4   : > { %448 = vadd.xlane.f32.xlu0 %v447_v6 }
 0x141   : > { %v449_v15 = vpop.xlane.xlu0 %448 }
 0x142   : > { %v450_v16 = vmul.f32 0.03125, %v449_v15 }
 0x144   : > { %v451_v17 = vadd.f32 1e-05, %v450_v16 }
 0x146   : > { %2476 = vrsqrt.f32 %v451_v17 }
 0x150   : > { %v2477_v18 = vpop.eup %2476 }
 0x151   : > { %v453_v20 = vmul.f32 %v2477_v18, %v445_v4 }
 0x153   : > { %v460_v22 = vmul.f32 %v2181_v19, %v453_v20 }
 0x155   : > { %v467_v23 = vadd.f32 %v2182_v21, %v460_v22 }
 0x157   : > { %2277 = vmatmul.mubr.msk.f32.vlgmr.msra.gmra.mrb[0].mxu1 %vm439_vm0, %v467_v23 }
 0x158   : > { %2281 = vmatprep.mubr.msk.f32.mxu1 %vm2563_vm1, %v2564_v13 }
 0x22a   : > { %v548_v25 = vpop.f32.mrb[0].mxu1 }
 0x22b   : > { %v2743_v26 = vadd.f32 %v2183_v24, %v548_v25  ;;  %v2278_v27 = vpop.f32.mrb[1].mxu1 }
 0x22d   : > { %568 = vrot.lane.b32.xlu0 %v2743_v26, %s2565_s23  ;;  %562 = vrot.lane.b32.xlu1 %v2743_v26, %s2566_s24  ;;  %s2575_s23 = smov 48   ;;  %s2576_s24 = smov 40  }
 0x231   : > { %565 = vrot.lane.b32.xlu1 %v2743_v26, %s2567_s30  ;;  %s2577_s30 = smov 56  }
 0x235   : > { %571 = vrot.lane.b32.xlu1 %v2743_v26, %s2568_s15  ;;  %s2578_s15 = smov 16  }
 0x239   : > { %553 = vrot.lane.b32.xlu1 %v2743_v26, %s2569_s16  ;;  %s2579_s16 = smov 8  }
 0x23d   : > { %556 = vrot.lane.b32.xlu1 %v2743_v26, %s2570_s20  ;;  %s2580_s20 = smov 24  }
 0x241   : > { %559 = vrot.lane.b32.xlu1 %v2743_v26, %s2571_s21 }
 0x29f   : > { %v563_v33 = vpop.permute.xlu1 %562  ;;  %v569_v37 = vpop.permute.xlu0 %568 }
 0x2a0   : > { %v618_v41 = vcombine.low %v563_v33, %v569_v37  ;;  %v619_v42 = vcombine.high %v563_v33, %v569_v37 }
 0x2a2   : > { %v626_v47 = vrot.slane %v618_v41, %v2759_v40  ;;  %v633_v48 = vrot.slane %v619_v42, %v2759_v40 }
 0x2a3   : > { %v566_v38 = vpop.permute.xlu1 %565 }
 0x2a7   : > { %v572_v43 = vpop.permute.xlu1 %571 }
 0x2a8   : > { %v634_v44 = vcombine.low %v566_v38, %v572_v43  ;;  %v635_v45 = vcombine.high %v566_v38, %v572_v43 }
 0x2aa   : > { %v642_v49 = vrot.slane %v634_v44, %v2759_v40  ;;  %v649_v50 = vrot.slane %v635_v45, %v2759_v40 }
 0x2ab   : > { %v554_v51 = vpop.permute.xlu1 %553 }
 0x2ac   : > { %v682_v52 = vcombine.low %v626_v47, %v642_v49  ;;  %v683_v53 = vcombine.high %v626_v47, %v642_v49  ;;  %v698_v54 = vcombine.low %v633_v48, %v649_v50  ;;  %v699_v55 = vcombine.high %v633_v48, %v649_v50 }
 0x2ae   : > { %v690_v56 = vrot.slane %v682_v52, %v2762_v46  ;;  %v697_v57 = vrot.slane %v683_v53, %v2762_v46  ;;  %v706_v58 = vrot.slane %v698_v54, %v2762_v46  ;;  %v713_v59 = vrot.slane %v699_v55, %v2762_v46 }
 0x2af   : > { %v557_v60 = vpop.permute.xlu1 %556 }
 0x2b0   : > { %v2186_v61 = vcombine.low %v690_v56, %v697_v57  ;;  %v2188_v62 = vcombine.high %v690_v56, %v697_v57  ;;  %v2190_v63 = vcombine.low %v706_v58, %v713_v59  ;;  %v2192_v1 = vcombine.high %v706_v58, %v713_v59 }
 0x2b1   : > { %v586_v2 = vcombine.low %v2743_v26, %v557_v60  ;;  %v587_v3 = vcombine.high %v2743_v26, %v557_v60 }
 0x2b2   : > { %v805_v4 = vrot.slane %v2186_v61, %v2759_v40  ;;  %v821_v5 = vrot.slane %v2188_v62, %v2759_v40  ;;  %v837_v6 = vrot.slane %v2190_v63, %v2759_v40  ;;  %v853_v7 = vrot.slane %v2192_v1, %v2759_v40 }
 0x2b3   : > { %v560_v8 = vpop.permute.xlu1 %559  ;;  %v594_v15 = vrot.slane %v586_v2, %v2759_v40  ;;  %v601_v16 = vrot.slane %v587_v3, %v2759_v40 }
 0x2b4   : > { %v870_v9 = vcombine.low %v805_v4, %v821_v5  ;;  %v902_v11 = vcombine.low %v837_v6, %v853_v7  ;;  %v602_v12 = vcombine.low %v554_v51, %v560_v8  ;;  %v603_v14 = vcombine.high %v554_v51, %v560_v8 }
 0x2b5   : > { %v871_v17 = vcombine.high %v805_v4, %v821_v5  ;;  %v903_v18 = vcombine.high %v837_v6, %v853_v7 }
 0x2b6   : > { %v610_v19 = vrot.slane %v602_v12, %v2759_v40  ;;  %v617_v20 = vrot.slane %v603_v14, %v2759_v40  ;;  %v878_v21 = vrot.slane %v870_v9, %v2762_v46  ;;  %v910_v22 = vrot.slane %v902_v11, %v2762_v46 }
 0x2b7   : > { %v885_v23 = vrot.slane %v871_v17, %v2762_v46  ;;  %v917_v24 = vrot.slane %v903_v18, %v2762_v46 }
 0x2b8   : > { %v650_v25 = vcombine.low %v594_v15, %v610_v19  ;;  %v651_v27 = vcombine.high %v594_v15, %v610_v19  ;;  %v666_v28 = vcombine.low %v601_v16, %v617_v20  ;;  %v667_v31 = vcombine.high %v601_v16, %v617_v20 }
 0x2b9   : > { %v922_v32 = vcombine.low %v878_v21, %v910_v22  ;;  %v924_v33 = vcombine.low %v885_v23, %v917_v24  ;;  %v923_v58 = vcombine.high %v878_v21, %v910_v22  ;;  %v925_v60 = vcombine.high %v885_v23, %v917_v24 }
 0x2ba   : > { %v658_v34 = vrot.slane %v650_v25, %v2762_v46  ;;  %v665_v35 = vrot.slane %v651_v27, %v2762_v46  ;;  %v674_v36 = vrot.slane %v666_v28, %v2762_v46  ;;  %v681_v37 = vrot.slane %v667_v31, %v2762_v46 }
 0x2bb   : > { %2280 = vmatpush3.xpose.msk.msra.mxu1 %vm999_vm3, %v922_v32  ;;  %2290 = vmatpush3.xpose.msk.msra.mxu0 %vm999_vm3, %v924_v33 }
 0x2bc   : > { %v2185_v38 = vcombine.low %v658_v34, %v665_v35  ;;  %v2187_v39 = vcombine.high %v658_v34, %v665_v35  ;;  %v2189_v41 = vcombine.low %v674_v36, %v681_v37  ;;  %v2191_v42 = vcombine.high %v674_v36, %v681_v37  ;;  %2284 = vmatprep.subr.mxu1 %v2564_v13 }
 0x2bd   : > { %2299 = vmatprep.subr.mxu0 %v2564_v13 }
 0x2be   : > { %v798_v43 = vrot.slane %v2185_v38, %v2759_v40  ;;  %v814_v44 = vrot.slane %v2187_v39, %v2759_v40  ;;  %v830_v45 = vrot.slane %v2189_v41, %v2759_v40  ;;  %v846_v47 = vrot.slane %v2191_v42, %v2759_v40 }
 0x2c0   : > { %v854_v48 = vcombine.low %v798_v43, %v814_v44  ;;  %v886_v49 = vcombine.low %v830_v45, %v846_v47  ;;  %v855_v50 = vcombine.high %v798_v43, %v814_v44  ;;  %v887_v51 = vcombine.high %v830_v45, %v846_v47 }
 0x2c2   : > { %v862_v52 = vrot.slane %v854_v48, %v2762_v46  ;;  %v894_v53 = vrot.slane %v886_v49, %v2762_v46  ;;  %v869_v54 = vrot.slane %v855_v50, %v2762_v46  ;;  %v901_v55 = vrot.slane %v887_v51, %v2762_v46 }
 0x2c4   : > { %v918_v56 = vcombine.low %v862_v52, %v894_v53  ;;  %v920_v57 = vcombine.low %v869_v54, %v901_v55  ;;  %v919_v59 = vcombine.high %v862_v52, %v894_v53  ;;  %v921_v61 = vcombine.high %v869_v54, %v901_v55 }
 0x2c6   : > { %2282 = vmatmul.mubr.msk.f32.vlgmr.msra.gmra.mrb[2].mxu1 %vm999_vm3, %v918_v56  ;;  %2292 = vmatmul.mubr.msk.f32.vlgmr.msra.gmra.mrb[0].mxu0 %vm999_vm3, %v920_v57 }
 0x2c7   : > { %2285 = vmatpush3.xpose.msk.msra.mxu1 %vm999_vm3, %v923_v58  ;;  %2286 = vmatprep.mubr.msk.f32.mxu1 %vm2563_vm1, %v2564_v13 }
 0x2c8   : > { %2294 = vmatprep.subr.mxu1 %v2564_v13  ;;  %2301 = vmatprep.mubr.msk.f32.mxu0 %vm2563_vm1, %v2564_v13 }
 0x2ca   : > { %2287 = vmatmul.mubr.msk.f32.vlgmr.msra.gmra.mrb[4].mxu1 %vm999_vm3, %v919_v59 }
 0x2cb   : > { %2295 = vmatpush3.xpose.msk.msra.mxu1 %vm999_vm3, %v925_v60  ;;  %2296 = vmatprep.mubr.msk.f32.mxu1 %vm2563_vm1, %v2564_v13 }
 0x2cc   : > { %2304 = vmatprep.subr.mxu1 %v2564_v13 }
 0x2ce   : > { %2297 = vmatmul.mubr.msk.f32.vlgmr.msra.gmra.mrb[6].mxu1 %vm999_vm3, %v921_v61 }
 0x2cf   : > { %2306 = vmatprep.mubr.msk.f32.mxu1 %vm2563_vm1, %v2564_v13 }
 0x399   : > { %v1072_v62 = vpop.f32.mrb[2].mxu1  ;;  %v1224_v63 = vpop.f32.mrb[0].mxu0 }
 0x39a   : > { %v1306_v1 = vsel %vm998_vm2, %v1072_v62, -1e+30  ;;  %v1308_v2 = vsel %vm998_vm2, %v1224_v63, -1e+30  ;;  %v2283_v3 = vpop.f32.mrb[3].mxu1  ;;  %v2293_v4 = vpop.f32.mrb[1].mxu0 }
 0x39b   : > { %v1310_v5 = vsel %vm999_vm3, %v1306_v1, -inf  ;;  %v1316_v9 = vsel %vm999_vm3, %v1308_v2, -inf }
 0x39c   : > { %1311 = vmax.xlane.f32.xlu1 %v1310_v5 }
 0x39d   : > { %v1148_v6 = vpop.f32.mrb[4].mxu1 }
 0x39e   : > { %v1307_v7 = vsel %vm998_vm2, %v1148_v6, -1e+30  ;;  %v2288_v8 = vpop.f32.mrb[5].mxu1 }
 0x39f   : > { %v1313_v11 = vsel %vm999_vm3, %v1307_v7, -inf }
 0x3a0   : > { %1317 = vmax.xlane.f32.xlu1 %v1316_v9  ;;  %1314 = vmax.xlane.f32.xlu0 %v1313_v11 }
 0x3a1   : > { %v1300_v12 = vpop.f32.mrb[6].mxu1 }
 0x3a2   : > { %v1309_v14 = vsel %vm998_vm2, %v1300_v12, -1e+30  ;;  %v2298_v15 = vpop.f32.mrb[7].mxu1 }
 0x3a3   : > { %v1319_v16 = vsel %vm999_vm3, %v1309_v14, -inf }
 0x3a4   : > { %1320 = vmax.xlane.f32.xlu0 %v1319_v16 }
 0x3b1   : > { %574 = vrot.lane.b32.xlu1 %v2743_v26, %s2574_s22  ;;  %s2217_s22 = sshll.u32 %s2673_s29, 7 }
 0x3b2   : > { %s3021_s1 = scalar_lea.hbm %s3077_s13, %s2217_s22 }
 0x429   : > { %v1312_v17 = vpop.xlane.xlu1 %1311 }
 0x42a   : > { %v1322_v18 = vsub.f32 %v1306_v1, %v1312_v17 }
 0x42c   : > { %v1326_v19 = vmul.f32 1.442695, %v1322_v18 }
 0x42d   : > { %v1318_v20 = vpop.xlane.xlu1 %1317  ;;  %v1315_v21 = vpop.xlane.xlu0 %1314 }
 0x42e   : > { %2478 = vpow2.f32 %v1326_v19  ;;  %v1324_v22 = vsub.f32 %v1308_v2, %v1318_v20  ;;  %v1323_v23 = vsub.f32 %v1307_v7, %v1315_v21 }
 0x430   : > { %v1330_v24 = vmul.f32 1.442695, %v1324_v22  ;;  %v1328_v25 = vmul.f32 1.442695, %v1323_v23 }
 0x431   : > { %v1321_v27 = vpop.xlane.xlu0 %1320  ;;  %v575_v38 = vpop.permute.xlu1 %574 }
 0x432   : > { %2480 = vpow2.f32 %v1330_v24  ;;  %v1325_v29 = vsub.f32 %v1309_v14, %v1321_v27 }
 0x433   : > { %2482 = vpow2.f32 %v1328_v25 }
 0x434   : > { %v1332_v30 = vmul.f32 1.442695, %v1325_v29 }
 0x436   : > { %2484 = vpow2.f32 %v1332_v30 }
 0x438   : > { %v2835_v28 = vpop.eup %2478 }
 0x439   : > { %v1334_v31 = vsel %vm999_vm3, %v2835_v28, 0.0 }
 0x43a   : > { %1335 = vadd.xlane.f32.xlu1 %v1334_v31 }
 0x43c   : > { %v2839_v32 = vpop.eup %2480 }
 0x43d   : > { %v2841_v33 = vpop.eup %2482  ;;  %v1340_v34 = vsel %vm999_vm3, %v2839_v32, 0.0 }
 0x43e   : > { %1341 = vadd.xlane.f32.xlu1 %v1340_v34  ;;  %v1337_v35 = vsel %vm999_vm3, %v2841_v33, 0.0 }
 0x43f   : > { %1338 = vadd.xlane.f32.xlu0 %v1337_v35 }
 0x440   : > { %v2847_v36 = vpop.eup %2484 }
 0x441   : > { %v1343_v37 = vsel %vm999_vm3, %v2847_v36, 0.0 }
 0x443   : > { %1344 = vadd.xlane.f32.xlu0 %v1343_v37 }
 0x44f   : > { %580 = vrot.lane.b32.xlu1 %v2743_v26, %s2575_s23 }
 0x453   : > { %583 = vrot.lane.b32.xlu1 %v2743_v26, %s2576_s24 }
 0x459   : > { %577 = vrot.lane.b32.xlu0 %v2743_v26, %s2577_s30 }
 0x4c7   : > { %v1336_v39 = vpop.xlane.xlu1 %1335 }
 0x4c8   : > { %2486 = vrcp.f32 %v1336_v39 }
 0x4cb   : > { %v1342_v41 = vpop.xlane.xlu1 %1341 }
 0x4cc   : > { %v1339_v42 = vpop.xlane.xlu0 %1338 }
 0x4cd   : > { %2488 = vrcp.f32 %v1339_v42 }
 0x4ce   : > { %2490 = vrcp.f32 %v1342_v41 }
 0x4cf   : > { %v581_v43 = vpop.permute.xlu1 %580 }
 0x4d0   : > { %v1345_v44 = vpop.xlane.xlu0 %1344  ;;  %v722_v45 = vcombine.low %v575_v38, %v581_v43  ;;  %v723_v47 = vcombine.high %v575_v38, %v581_v43 }
 0x4d1   : > { %2492 = vrcp.f32 %v1345_v44 }
 0x4d2   : > { %v730_v52 = vrot.slane %v722_v45, %v2759_v40  ;;  %v737_v53 = vrot.slane %v723_v47, %v2759_v40  ;;  %v2487_v8 = vpop.eup %2486 }
 0x4d3   : > { %v584_v48 = vpop.permute.xlu1 %583  ;;  %v1350_v24 = vmul.f32 %v2487_v8, %v2835_v28  ;;  %v1799_v28 = vld [vmem:[%s3069_s5] sm:$0xff] }
 0x4d4   : > { %v578_v49 = vpop.permute.xlu0 %577 }
 0x4d5   : > { %v738_v50 = vcombine.low %v578_v49, %v584_v48  ;;  %v739_v51 = vcombine.high %v578_v49, %v584_v48 }
 0x4d7   : > { %v746_v54 = vrot.slane %v738_v50, %v2759_v40  ;;  %v753_v26 = vrot.slane %v739_v51, %v2759_v40  ;;  %v2489_v15 = vpop.eup %2488 }
 0x4d8   : > { %v2491_v18 = vpop.eup %2490  ;;  %v1351_v25 = vmul.f32 %v2489_v15, %v2841_v33 }
 0x4d9   : > { %v754_v55 = vcombine.low %v730_v52, %v746_v54  ;;  %v755_v56 = vcombine.high %v730_v52, %v746_v54  ;;  %v770_v57 = vcombine.low %v737_v53, %v753_v26  ;;  %v771_v58 = vcombine.high %v737_v53, %v753_v26 }
 0x4da   : > { %v1352_v30 = vmul.f32 %v2491_v18, %v2839_v32  ;;  %v1800_v32 = vld [vmem:[%s3069_s5 + $0x8] sm:$0xff] }
 0x4db   : > { %v762_v59 = vrot.slane %v754_v55, %v2762_v46  ;;  %v769_v60 = vrot.slane %v755_v56, %v2762_v46  ;;  %v778_v61 = vrot.slane %v770_v57, %v2762_v46  ;;  %v785_v62 = vrot.slane %v771_v58, %v2762_v46  ;;  %v2493_v23 = vpop.eup %2492  ;;  %v1801_v55 = vld [vmem:[%s3069_s5 + $0x10] sm:$0xff]  ;;  %v1802_v56 = vld [vmem:[%s3069_s5 + $0x18] sm:$0xff] }
 0x4dc   : > { %v1353_v31 = vmul.f32 %v2493_v23, %v2847_v36  ;;  %v2383_v33 = vpack.c.bf16 %v1800_v32, %v1799_v28 }
 0x4dd   : > { %v926_v63 = vcombine.low %v762_v59, %v769_v60  ;;  %v2193_v1 = vcombine.high %v762_v59, %v769_v60  ;;  %v942_v2 = vcombine.low %v778_v61, %v785_v62  ;;  %v2194_v3 = vcombine.high %v778_v61, %v785_v62 }
 0x4de   : > { %v2386_v61 = vpack.c.bf16 %v1802_v56, %v1801_v55  ;;  %v2010_v55 = vld [vmem:[%s3075_s11 + $0x18] sm:$0xff] }
 0x4df   : > { %v933_v4 = vrot.slane %v926_v63, %v2759_v40  ;;  %v941_v5 = vrot.slane %v2193_v1, %v2759_v40  ;;  %v949_v6 = vrot.slane %v942_v2, %v2759_v40  ;;  %v957_v7 = vrot.slane %v2194_v3, %v2759_v40 }
 0x4e1   : > { %v958_v9 = vcombine.low %v933_v4, %v941_v5  ;;  %v974_v11 = vcombine.low %v949_v6, %v957_v7  ;;  %v959_v12 = vcombine.high %v933_v4, %v941_v5  ;;  %v975_v14 = vcombine.high %v949_v6, %v957_v7 }
 0x4e3   : > { %v966_v16 = vrot.slane %v958_v9, %v2762_v46  ;;  %v982_v17 = vrot.slane %v974_v11, %v2762_v46  ;;  %v973_v19 = vrot.slane %v959_v12, %v2762_v46  ;;  %v989_v20 = vrot.slane %v975_v14, %v2762_v46 }
 0x4e5   : > { %v990_v21 = vcombine.low %v966_v16, %v982_v17  ;;  %v991_v22 = vcombine.high %v966_v16, %v982_v17  ;;  %v992_v27 = vcombine.low %v973_v19, %v989_v20  ;;  %v993_v29 = vcombine.high %v973_v19, %v989_v20 }
 0x4e7   : > { %2300 = vmatpush3.msra.mxu0 %v990_v21  ;;  %2305 = vmatpush3.msra.mxu1 %v991_v22 }
 0x4e8   : > { %2302 = vmatmul.mubr.msk.f32.vlgmr.msra.gmra.mrb[2].mxu0 %vm999_vm3, %v1350_v24  ;;  %2307 = vmatmul.mubr.msk.f32.vlgmr.msra.gmra.mrb[8].mxu1 %vm999_vm3, %v1351_v25 }
 0x4e9   : > { %2309 = vmatprep.subr.mxu0 %v2564_v13  ;;  %2314 = vmatprep.subr.mxu1 %v2564_v13 }
 0x4ea   : > { %2310 = vmatpush3.msra.mxu0 %v992_v27  ;;  %2315 = vmatpush3.msra.mxu1 %v993_v29  ;;  %v2210_v27 = vld [vmem:[%s3070_s6] ss:$0 sm:$0xff] }
 0x4eb   : > { %2311 = vmatprep.mubr.msk.f32.mxu0 %vm2563_vm1, %v2564_v13  ;;  %2316 = vmatprep.mubr.msk.f32.mxu1 %vm2563_vm1, %v2564_v13 }
 0x4ec   : > { %2312 = vmatmul.mubr.msk.f32.vlgmr.msra.gmra.mrb[4].mxu0 %vm999_vm3, %v1352_v30  ;;  %2317 = vmatmul.mubr.msk.f32.vlgmr.msra.gmra.mrb[10].mxu1 %vm999_vm3, %v1353_v31 }
 0x4ed   : > { %2382 = vmatprep.subr.bf16.mxu1 %v2562_v10  ;;  %2327 = vmatprep.mubr.msk.f32.mxu1 %vm2563_vm1, %v2564_v13 }
 0x4ee   : > { %2394 = vmatprep.subr.bf16.mxu0 %v2562_v10  ;;  %2373 = vmatprep.mubr.msk.f32.mxu0 %vm2563_vm1, %v2564_v13 }
 0x4ef   : > { %2384 = vmatpush3.bf16.msra.mxu1 %v2383_v33 }
 0x4f0   : > { %2385 = vmatprep.subr.bf16.mxu1 %v2562_v10 }
 0x4f3   : > { %2387 = vmatpush3.bf16.msra.mxu1 %v2386_v61  ;;  %v2014_v61 = vld [vmem:[%s3075_s11 + $0x38] sm:$0xff] }
 0x4f4   : > { %2388 = vmatprep.subr.bf16.mxu1 %v2562_v10 }
 0x5bb   : > { %v1423_v34 = vpop.f32.mrb[2].mxu0  ;;  %v1496_v35 = vpop.f32.mrb[8].mxu1 }
 0x5bc   : > { %v2303_v36 = vpop.f32.mrb[3].mxu0  ;;  %v2308_v37 = vpop.f32.mrb[9].mxu1 }
 0x5bd   : > { %v1914_v36 = vld [vmem:[%s3073_s9] sm:$0xff] }
 0x5bf   : > { %v1569_v38 = vpop.f32.mrb[4].mxu0  ;;  %v1642_v39 = vpop.f32.mrb[10].mxu1 }
 0x5c0   : > { %v1646_v41 = vcombine.low %v1423_v34, %v1569_v38  ;;  %v1647_v42 = vcombine.high %v1423_v34, %v1569_v38  ;;  %v1662_v43 = vcombine.low %v1496_v35, %v1642_v39  ;;  %v1663_v44 = vcombine.high %v1496_v35, %v1642_v39  ;;  %v2313_v45 = vpop.f32.mrb[5].mxu0  ;;  %v2318_v47 = vpop.f32.mrb[11].mxu1  ;;  %v1916_v38 = vld [vmem:[%s3073_s9 + $0x10] sm:$0xff]  ;;  %v1917_v39 = vld [vmem:[%s3073_s9 + $0x18] sm:$0xff] }
 0x5c2   : > { %v1654_v48 = vrot.slane %v1646_v41, %v2759_v40  ;;  %v1661_v49 = vrot.slane %v1647_v42, %v2759_v40  ;;  %v1670_v50 = vrot.slane %v1662_v43, %v2759_v40  ;;  %v1677_v51 = vrot.slane %v1663_v44, %v2759_v40  ;;  %v2007_v42 = vld [vmem:[%s3075_s11] sm:$0xff]  ;;  %v2008_v43 = vld [vmem:[%s3075_s11 + $0x8] sm:$0xff] }
 0x5c3   : > { %v2392_v41 = vpack.c.bf16 %v1917_v39, %v1916_v38  ;;  %v2395_v44 = vpack.c.bf16 %v2008_v43, %v2007_v42 }
 0x5c4   : > { %v1678_v52 = vcombine.low %v1654_v48, %v1670_v50  ;;  %v1679_v53 = vcombine.high %v1654_v48, %v1670_v50  ;;  %v1694_v54 = vcombine.low %v1661_v49, %v1677_v51  ;;  %v1695_v26 = vcombine.high %v1661_v49, %v1677_v51  ;;  %v2211_v50 = vld [vmem:[%s3071_s7] ss:$0 sm:$0xff] }
 0x5c5   : > { %2396 = vmatpush3.bf16.msra.mxu0 %v2395_v44 }
 0x5c6   : > { %v1686_v57 = vrot.slane %v1678_v52, %v2762_v46  ;;  %v1693_v58 = vrot.slane %v1679_v53, %v2762_v46  ;;  %v1702_v59 = vrot.slane %v1694_v54, %v2762_v46  ;;  %v1709_v60 = vrot.slane %v1695_v26, %v2762_v46  ;;  %2397 = vmatprep.subr.bf16.mxu0 %v2562_v10  ;;  %v2212_v52 = vld [vmem:[%s3072_s8] ss:$0 sm:$0xff]  ;;  %v2009_v26 = vld [vmem:[%s3075_s11 + $0x10] sm:$0xff] }
 0x5c7   : > { %v2398_v56 = vpack.c.bf16 %v2010_v55, %v2009_v26 }
 0x5c8   : > { %v1714_v62 = vcombine.low %v1686_v57, %v1693_v58  ;;  %v2207_v63 = vcombine.high %v1686_v57, %v1693_v58  ;;  %v1730_v1 = vcombine.low %v1702_v59, %v1709_v60  ;;  %v2208_v2 = vcombine.high %v1702_v59, %v1709_v60  ;;  %v2011_v57 = vld [vmem:[%s3075_s11 + $0x20] sm:$0xff]  ;;  %v2012_v58 = vld [vmem:[%s3075_s11 + $0x28] sm:$0xff]  ;;  %v2013_v60 = vld [vmem:[%s3075_s11 + $0x30] sm:$0xff] }
 0x5c9   : > { %2399 = vmatpush3.bf16.msra.mxu0 %v2398_v56  ;;  %v2401_v59 = vpack.c.bf16 %v2012_v58, %v2011_v57 }
 0x5ca   : > { %v1721_v3 = vrot.slane %v1714_v62, %v2759_v40  ;;  %v1729_v4 = vrot.slane %v2207_v63, %v2759_v40  ;;  %v1737_v5 = vrot.slane %v1730_v1, %v2759_v40  ;;  %v1745_v6 = vrot.slane %v2208_v2, %v2759_v40  ;;  %2400 = vmatprep.subr.bf16.mxu0 %v2562_v10  ;;  %v2015_v63 = vld [vmem:[%s3075_s11 + $0x40] sm:$0xff]  ;;  %v2016_v1 = vld [vmem:[%s3075_s11 + $0x48] sm:$0xff] }
 0x5cb   : > { %v2404_v62 = vpack.c.bf16 %v2014_v61, %v2013_v60  ;;  %v2407_v2 = vpack.c.bf16 %v2016_v1, %v2015_v63 }
 0x5cc   : > { %v1747_v7 = vcombine.high %v1721_v3, %v1729_v4  ;;  %v1763_v8 = vcombine.high %v1737_v5, %v1745_v6  ;;  %v1746_v9 = vcombine.low %v1721_v3, %v1729_v4  ;;  %v1762_v11 = vcombine.low %v1737_v5, %v1745_v6  ;;  %v2017_v3 = vld [vmem:[%s3075_s11 + $0x50] sm:$0xff]  ;;  %v2018_v4 = vld [vmem:[%s3075_s11 + $0x58] sm:$0xff]  ;;  %v2019_v6 = vld [vmem:[%s3075_s11 + $0x60] sm:$0xff] }
 0x5cd   : > { %2402 = vmatpush3.bf16.msra.mxu0 %v2401_v59  ;;  %v2410_v5 = vpack.c.bf16 %v2018_v4, %v2017_v3 }
 0x5ce   : > { %v1761_v12 = vrot.slane %v1747_v7, %v2762_v46  ;;  %v1777_v14 = vrot.slane %v1763_v8, %v2762_v46  ;;  %v1754_v15 = vrot.slane %v1746_v9, %v2762_v46  ;;  %v1770_v16 = vrot.slane %v1762_v11, %v2762_v46  ;;  %2403 = vmatprep.subr.bf16.mxu0 %v2562_v10  ;;  %v2020_v7 = vld [vmem:[%s3075_s11 + $0x68] sm:$0xff]  ;;  %v2021_v9 = vld [vmem:[%s3075_s11 + $0x70] sm:$0xff]  ;;  %v2022_v11 = vld [vmem:[%s3075_s11 + $0x78] sm:$0xff] }
 0x5cf   : > { %v2413_v8 = vpack.c.bf16 %v2020_v7, %v2019_v6 }
 0x5d0   : > { %v1780_v17 = vcombine.low %v1761_v12, %v1777_v14  ;;  %v1779_v18 = vcombine.high %v1754_v15, %v1770_v16  ;;  %v1781_v19 = vcombine.high %v1761_v12, %v1777_v14  ;;  %v1778_v20 = vcombine.low %v1754_v15, %v1770_v16  ;;  %v2213_v14 = vld [vmem:[%s3074_s10] ss:$0 sm:$0xff] }
 0x5d1   : > { %2405 = vmatpush3.bf16.msra.mxu0 %v2404_v62  ;;  %v2416_v12 = vpack.c.bf16 %v2022_v11, %v2021_v9 }
 0x5d2   : > { %1787 = vrot.lane.b32.xlu1 %v1780_v17, %s2578_s15  ;;  %1783 = vrot.lane.b32.xlu0 %v1779_v18, %s2579_s16  ;;  %s429_s15 = sand.u32 1, %s2552_s26  }
 0x5d3   : > { %2406 = vmatprep.subr.bf16.mxu0 %v2562_v10  ;;  %s2179_s16 = sshll.u32 %s429_s15, 3 }
 0x5d4   : > { %s431_s23 = scalar_lea.vmem [#allocation2], %s2179_s16  ;;  %s2581_s16 = smov [#allocation2]  }
 0x5d5   : > { %2408 = vmatpush3.bf16.msra.mxu0 %v2407_v2  ;;  %s2116_s24 = sshll.u32 %s431_s23, 4  ;;  %s2502_s21 = sshll.u32 %s2581_s16, 4  ;;  %s3023_s24 = int_to_ptr.vmem [resolvable:$true] %s2116_s24  ;;  %s2503_s21 = int_to_ptr.vmem [resolvable:$false] %s2502_s21 }
 0x5d6   : > { %1791 = vrot.lane.b32.xlu0 %v1781_v19, %s2580_s20  ;;  %2409 = vmatprep.subr.bf16.mxu0 %v2562_v10  ;;  %s2103_s20 = scalar_lea.sflag [#allocation3], %s429_s15  ;;  %s2498_s29 = scalar_lea.vmem %s3023_s24, 128 }
 0x5d7   : > { %p2499_p11 = scmp.ne.s32.totalorder %s3023_s24, %s2498_s29  ;;  %s2504_s2 = scalar_lea.vmem %s2503_s21, 256 }
 0x5d8   : > { %p2505_p0 = scmp.lt.s32.totalorder %s3023_s24, %s2503_s21  ;;  %p2506_p1 = scmp.lt.s32.totalorder %s2504_s2, %s2498_s29 }
 0x5d9   : > { %2411 = vmatpush3.bf16.msra.mxu0 %v2410_v5  ;;  %p2500_p12 = pnand %p2499_p11, %p2690_p5 }
 0x5da   : > { %2412 = vmatprep.subr.bf16.mxu0 %v2562_v10  ;;  %p2507_p2 = por %p2506_p1, %p2505_p0 }
 0x5db   : > { %p2501_p13 = pneg %p2500_p12 }
 0x5dd   : > { %2414 = vmatpush3.bf16.msra.mxu0 %v2413_v8  ;;  %p2508_p3 = pnand %p2507_p2, %p2501_p13 }
 0x5de   : > { %2415 = vmatprep.subr.bf16.mxu0 %v2562_v10 }
 0x5e1   : > { %2417 = vmatpush3.bf16.msra.mxu0 %v2416_v12 }
 0x644   : > { %v1784_v40 = vpop.permute.xlu0 %1783  ;;  %v1788_v21 = vpop.permute.xlu1 %1787 }
 0x645   : > { %v1794_v22 = vsel %vm999_vm3, %v1778_v20, %v1784_v40 }
 0x646   : > { %v1796_v24 = vsel %vm1795_vm4, %v1794_v22, %v1788_v21 }
 0x648   : > { %v1792_v23 = vpop.permute.xlu0 %1791 }
 0x649   : > { %v1798_v25 = vsel %vm1797_vm5, %v1796_v24, %v1792_v23 }
 0x64a   : > { %2328 = vmatmul.mubr.msk.f32.vlgmr.msra.gmra.mrb[12].mxu1 %vm439_vm0, %v1798_v25  ;;  %v2215_v25 = vld [vmem:[%s3076_s12] ss:$0 sm:$0xff] }
 0x64b   : > { %2338 = vmatprep.mubr.msk.f32.mxu1 %vm2563_vm1, %v2564_v13 }
 0x71d   : > { %v1872_v46 = vpop.f32.mrb[12].mxu1 }
 0x71e   : > { %v1876_v29 = vadd.f32 %v1872_v46, %v2705_v0  ;;  %v2329_v30 = vpop.f32.mrb[13].mxu1  ;;  %v1915_v0 = vld [vmem:[%s3073_s9 + $0x8] sm:$0xff] }
 0x71f   : > { %v2389_v37 = vpack.c.bf16 %v1915_v0, %v1914_v36 }
 0x720   : > { %v2928_v31 = vadd.f32 %v2210_v27, %v1876_v29 }
 0x721   : > { %2390 = vmatpush3.bf16.msra.mxu1 %v2389_v37 }
 0x722   : > { %v1887_v28 = vsel %vm439_vm0, %v2928_v31, 0.0  ;;  %2391 = vmatprep.subr.bf16.mxu1 %v2562_v10 }
 0x723   : > { %1888 = vadd.xlane.f32.xlu1 %v1887_v28 }
 0x725   : > { %2393 = vmatpush3.bf16.msra.mxu1 %v2392_v41 }
 0x7b0   : > { %v1889_v32 = vpop.xlane.xlu1 %1888 }
 0x7b1   : > { %v1890_v33 = vmul.f32 0.03125, %v1889_v32 }
 0x7b3   : > { %v1891_v34 = vsub.f32 %v2928_v31, %v1890_v33 }
 0x7b5   : > { %v1892_v35 = vmul.f32 %v1891_v34, %v1891_v34 }
 0x7b7   : > { %v1893_v13 = vsel %vm439_vm0, %v1892_v35, 0.0 }
 0x7b8   : > { %1894 = vadd.xlane.f32.xlu0 %v1893_v13 }
 0x845   : > { %v1895_v45 = vpop.xlane.xlu0 %1894 }
 0x846   : > { %v1896_v47 = vmul.f32 0.03125, %v1895_v45 }
 0x848   : > { %v1897_v48 = vadd.f32 1e-05, %v1896_v47 }
 0x84a   : > { %2494 = vrsqrt.f32 %v1897_v48 }
 0x854   : > { %v2495_v49 = vpop.eup %2494 }
 0x855   : > { %v1899_v51 = vmul.f32 %v2495_v49, %v1891_v34 }
 0x857   : > { %v1906_v53 = vmul.f32 %v2211_v50, %v1899_v51 }
 0x859   : > { %v1913_v54 = vadd.f32 %v2212_v52, %v1906_v53 }
 0x85b   : > { %2339 = vmatmul.mubr.msk.f32.vlgmr.msra.gmra.mrb[14].mxu1 %vm439_vm0, %v1913_v54 }
 0x92e   : > { %v1994_v15 = vpop.f32.mrb[14].mxu1 }
 0x92f   : > { %v1995_v16 = vadd.f32 %v2213_v14, %v1994_v15  ;;  %v2340_v17 = vpop.f32.mrb[15].mxu1 }
 0x931   : > { %v1999_v18 = vmul.f32 0.044715, %v1995_v16  ;;  %v1998_v23 = vmul.f32 0.5, %v1995_v16 }
 0x933   : > { %v2000_v19 = vmul.f32 %v1999_v18, %v1995_v16 }
 0x935   : > { %v2001_v20 = vmul.f32 %v2000_v19, %v1995_v16 }
 0x937   : > { %v2002_v40 = vadd.f32 %v2001_v20, %v1995_v16 }
 0x939   : > { %v2003_v21 = vmul.f32 0.7978846, %v2002_v40 }
 0x93b   : > { %2496 = vtanh.f32 %v2003_v21 }
 0x945   : > { %v2497_v22 = vpop.eup %2496 }
 0x946   : > { %v2005_v24 = vadd.f32 1.0, %v2497_v22 }
 0x948   : > { %v2006_v10 = vmul.f32 %v2005_v24, %v1998_v23 }
 0x94a   : > { %2374 = vmatmul.mubr.f32.vlgmr.msra.gmra.mrb[6].mxu0 %v2006_v10 }
 0xa1d   : > { %v2096_v46 = vpop.f32.mrb[6].mxu0 }
 0xa1e   : > { %v2097_v27 = vadd.f32 %v2215_v25, %v2096_v46  ;;  %v2375_v29 = vpop.f32.mrb[7].mxu0 }
 0xa20   : > { %v2100_v30 = vadd.f32 %v2097_v27, %v2928_v31 }
 0xa22   : > { %2101 = vst.msk [vmem:[%s431_s23] sm:$0xff] %vm439_vm0, %v2100_v30 }
 0xa23   : > { %2511 = shalt.err (!%p2508_p3)
}
 0xa24   : > { %s2512_s15 = scalar_lea.hbm %s3021_s1, 128  ;;  %s2516_s30 = scalar_lea.hbm %s3077_s13, 256 }
 0xa25   : > { %p2513_p4 = scmp.ne.s32.totalorder %s3021_s1, %s2512_s15  ;;  %p2517_p9 = scmp.lt.u32.totalorder %s3021_s1, %s3077_s13 }
 0xa26   : > { %p2518_p10 = scmp.lt.u32.totalorder %s2516_s30, %s2512_s15  ;;  %p2520_p12 = scmp.lt.u32.totalorder %s2512_s15, %s3021_s1 }
 0xa27   : > { %p2514_p7 = pnand %p2513_p4, %p2690_p5 }
 0xa28   : > { %p2519_p11 = por %p2518_p10, %p2517_p9 }
 0xa29   : > { %p2515_p8 = pneg %p2514_p7 }
 0xa2a   : > { %p2521_p13 = por %p2520_p12, %p2519_p11 }
 0xa2c   : > { %p2522_p0 = pnand %p2521_p13, %p2515_p8 }
 0xa2e   : > { %2525 = shalt.err (!%p2522_p0)
}
 0xa2f   : > { %2418 = dma.vmem_to_hbm [thread:$0]  (%p2690_p5), %s3023_s24, 128, %s3021_s1, %s2103_s20  }
 0xa30 PF: > { %p2424_p1 = scmp.ge.s32.totalorder %s2560_s28, 2  ;;  %s2128_s2 = sand.u32 1, %s2548_s25  }
 0xa31   : > { %s2129_s29 = scalar_lea.sflag [#allocation3], %s2128_s2 }
 0xa32   : > { %p2421_p2 = pnand %p2424_p1, %p2694_p6 }
 0xa34   : > { %2543 = dma.done.wait (!%p2421_p2), %s2129_s29, 128  }
 0xa35   : > { %2545 = vsyncadd (!%p2421_p2), %s2129_s29, 4294967168  ;;  %p23_p3 = scmp.ge.s32.totalorder %s2677_s14, 4   ;;  %s3086_s25 = smov %s2552_s26 }
 0xa36   : > { %s3087_s26 = smov %s2556_s27  ;;  %s3088_s27 = smov %s2688_s17 }
 0xa37   : > { %s3089_s28 = smov %s2677_s14  ;;  %25 = sbr.rel (!%p23_p3) target bundleno = 7 (0x7), region = 107 }
 0xa3e   :  { %2134 = vsyncpa [#allocation3], 1 }
 0xa3f   :  { %2136 = vsyncpa [#allocation3 + $0x1], 1 }

</bundles_post_ra>
